<compile_context>
chip_gen: v6e
topology: v6e:2x2x1
jax: 0.10.0
libtpu: 0.0.40
codegen_flags: <defaults>
</compile_context>

<pallas_src>
import jax
import jax.numpy as jnp
from jax.experimental import pallas as pl
from jax.experimental.pallas import tpu as pltpu

N_EMBED = 64
HIDDEN = 4 * N_EMBED  # 256
DROPOUT = 0.2         # identity in eval mode


def _round_up(n, m):
    return ((n + m - 1) // m) * m


def ffn_kernel(x_ref, w1_ref, b1_ref, w2_ref, b2_ref, o_ref):
    # x_ref: (tm, C) input dtype, w1_ref: (C, H) bf16, b1_ref: (1, H) f32,
    # w2_ref: (H, C) bf16, b2_ref: (1, C) f32, o_ref: (tm, C) bf16.
    x = x_ref[...].astype(w1_ref.dtype)                      # in-kernel cast (VPU filler)
    h = jnp.dot(x, w1_ref[...], preferred_element_type=jnp.float32) + b1_ref[...]
    h = jnp.maximum(h, 0.0)                                   # ReLU
    o = jnp.dot(h.astype(w2_ref.dtype), w2_ref[...],
                preferred_element_type=jnp.float32) + b2_ref[...]
    # Dropout(p=0.2) in eval mode == identity.
    o_ref[...] = o.astype(o_ref.dtype)


def feed_forward(x, w1, b1, w2, b2, *, tm=1024, compute_dtype=jnp.bfloat16,
                 out_dtype=None):
    """x: (B, T, C) -> (B, T, C). Fused Linear->ReLU->Linear in one Pallas kernel.

    Output dtype defaults to the compute dtype (bf16) to minimize HBM store traffic;
    pass out_dtype=jnp.float32 if a downstream consumer truly needs f32.
    """
    B, T, C = x.shape
    H = w1.shape[1]
    M = B * T
    if out_dtype is None:
        out_dtype = compute_dtype

    # Row tile: as large as requested, clamped to the problem size, rounded to the
    # bf16 sublane packing (16 rows). Cap it so that whenever there is enough work
    # the grid has >= 2 steps (v7x dual-TC split + pipeline overlap).
    tm_eff = min(tm, _round_up(M, 16))
    if M > 16:
        tm_eff = min(tm_eff, _round_up(pl.cdiv(M, 2), 16))
    grid_m = pl.cdiv(M, tm_eff)   # ragged tail handled by Pallas partial-block masking

    # No activation cast / pad in the wrapper: x is DMA'd as-is and cast in-kernel.
    xf = x.reshape(M, C)

    # Weights are tiny (a few KiB) and fetched once; casting them here is negligible.
    w1c = w1.astype(compute_dtype)
    w2c = w2.astype(compute_dtype)
    b1f = b1.astype(jnp.float32).reshape(1, H)
    b2f = b2.astype(jnp.float32).reshape(1, C)

    cost = pl.CostEstimate(
        flops=4 * M * C * H,                       # two matmuls, 2 flops/MAC
        transcendentals=0,
        bytes_accessed=(xf.size * xf.dtype.itemsize
                        + M * C * jnp.dtype(out_dtype).itemsize
                        + w1c.size * w1c.dtype.itemsize
                        + w2c.size * w2c.dtype.itemsize
                        + b1f.size * 4 + b2f.size * 4),
    )

    out = pl.pallas_call(
        ffn_kernel,
        out_shape=jax.ShapeDtypeStruct((M, C), out_dtype),
        grid_spec=pltpu.PrefetchScalarGridSpec(
            num_scalar_prefetch=0,
            grid=(grid_m,),
            in_specs=[
                pl.BlockSpec((tm_eff, C), lambda i: (i, 0)),   # activations: row-tiled
                pl.BlockSpec((C, H), lambda i: (0, 0)),        # W1: VMEM-resident
                pl.BlockSpec((1, H), lambda i: (0, 0)),        # b1
                pl.BlockSpec((H, C), lambda i: (0, 0)),        # W2: VMEM-resident
                pl.BlockSpec((1, C), lambda i: (0, 0)),        # b2
            ],
            out_specs=pl.BlockSpec((tm_eff, C), lambda i: (i, 0)),
        ),
        compiler_params=pltpu.CompilerParams(
            dimension_semantics=("parallel",),
            vmem_limit_bytes=32 * 1024 * 1024,   # v5e scoped default is only 16 MiB
        ),
        cost_estimate=cost,
    )(xf, w1c, b1f, w2c, b2f)

    return out.reshape(B, T, C)


def init_params(key, n_embed=N_EMBED, hidden=HIDDEN, dtype=jnp.float32):
    """Deterministic init matching PyTorch nn.Linear shapes (weights stored transposed
    relative to torch so the kernel does x @ W)."""
    k1, k2, k3, k4 = jax.random.split(key, 4)
    bound1 = 1.0 / jnp.sqrt(n_embed)
    bound2 = 1.0 / jnp.sqrt(hidden)
    w1 = jax.random.uniform(k1, (n_embed, hidden), dtype, -bound1, bound1)
    b1 = jax.random.uniform(k2, (1, hidden), dtype, -bound1, bound1)
    w2 = jax.random.uniform(k3, (hidden, n_embed), dtype, -bound2, bound2)
    b2 = jax.random.uniform(k4, (1, n_embed), dtype, -bound2, bound2)
    return w1, b1, w2, b2


if __name__ == "__main__":
    key = jax.random.PRNGKey(0)
    kx, kp = jax.random.split(key)

    B, T, C = 2, 8, N_EMBED
    x = jax.random.normal(kx, (B, T, C), jnp.float32)
    w1, b1, w2, b2 = init_params(kp)

    out = feed_forward(x, w1, b1, w2, b2)
    out = jax.block_until_ready(out)
    assert out.shape == (B, T, C)
    out_f32 = out.astype(jnp.float32)

    # Reference with the same bf16 matmul inputs + f32 accumulation
    # (tolerance covers the bf16 output rounding).
    xb = x.reshape(-1, C).astype(jnp.bfloat16)
    h_ref = jnp.maximum(
        jnp.dot(xb, w1.astype(jnp.bfloat16), preferred_element_type=jnp.float32) + b1, 0.0)
    ref_bf16 = (jnp.dot(h_ref.astype(jnp.bfloat16), w2.astype(jnp.bfloat16),
                        preferred_element_type=jnp.float32) + b2).reshape(B, T, C)
    assert jnp.allclose(out_f32, ref_bf16, atol=1e-2, rtol=1e-2)

    # Sanity against the pure-f32 reference (bf16 rounding => looser tolerance).
    ref_f32 = (jnp.maximum(x.reshape(-1, C) @ w1 + b1, 0.0) @ w2 + b2).reshape(B, T, C)
    assert jnp.allclose(out_f32, ref_f32, atol=3e-2, rtol=3e-2)

    print("KERNEL_OK")
</pallas_src>

<mosaic_0001>
module attributes {stable_mosaic.version = 11 : i64} {
  func.func @ffn_kernel(%arg0: i32, %arg1: memref<16x64xf32, #tpu.memory_space<vmem>>, %arg2: memref<64x256xbf16, #tpu.memory_space<vmem>>, %arg3: memref<1x256xf32, #tpu.memory_space<vmem>>, %arg4: memref<256x64xbf16, #tpu.memory_space<vmem>>, %arg5: memref<1x64xf32, #tpu.memory_space<vmem>>, %arg6: memref<16x64xbf16, #tpu.memory_space<vmem>>) attributes {dimension_semantics = [#tpu.dimension_semantics<parallel>], iteration_bounds = array<i64: 1>, scalar_prefetch = 0 : i64, scratch_operands = 0 : i64, tpu.core_type = #tpu.core_type<tc>, window_params = [{transform_indices = @transform_0, window_bounds = array<i64: 16, 64>}, {pipeline_mode = #tpu.pipeline_mode<synchronous>, transform_indices = @transform_1, window_bounds = array<i64: 64, 256>}, {pipeline_mode = #tpu.pipeline_mode<synchronous>, transform_indices = @transform_2, window_bounds = array<i64: 1, 256>}, {pipeline_mode = #tpu.pipeline_mode<synchronous>, transform_indices = @transform_3, window_bounds = array<i64: 256, 64>}, {pipeline_mode = #tpu.pipeline_mode<synchronous>, transform_indices = @transform_4, window_bounds = array<i64: 1, 64>}, {transform_indices = @transform_5, window_bounds = array<i64: 16, 64>}]} {
    %c0 = arith.constant 0 : index
    %c0_0 = arith.constant 0 : index
    %0 = vector.load %arg1[%c0, %c0_0] : memref<16x64xf32, #tpu.memory_space<vmem>>, vector<16x64xf32>
    %1 = arith.truncf %0 : vector<16x64xf32> to vector<16x64xbf16>
    %c0_1 = arith.constant 0 : index
    %c0_2 = arith.constant 0 : index
    %2 = vector.load %arg2[%c0_1, %c0_2] : memref<64x256xbf16, #tpu.memory_space<vmem>>, vector<64x256xbf16>
    %cst = arith.constant dense<0.000000e+00> : vector<16x256xf32>
    %3 = tpu.matmul %1, %2, %cst {dimension_numbers = #tpu.dot_dimension_numbers<[1], [0], [0], [1], [0, 0, 1, 1], [], []>} : vector<16x64xbf16>, vector<64x256xbf16>, vector<16x256xf32> -> vector<16x256xf32>
    %c0_3 = arith.constant 0 : index
    %c0_4 = arith.constant 0 : index
    %4 = vector.load %arg3[%c0_3, %c0_4] : memref<1x256xf32, #tpu.memory_space<vmem>>, vector<1x256xf32>
    %5 = vector.broadcast %4 : vector<1x256xf32> to vector<16x256xf32>
    %6 = arith.addf %3, %5 : vector<16x256xf32>
    %cst_5 = arith.constant 0.000000e+00 : f32
    %7 = vector.broadcast %cst_5 : f32 to vector<16x256xf32>
    %8 = arith.maximumf %6, %7 : vector<16x256xf32>
    %9 = arith.truncf %8 : vector<16x256xf32> to vector<16x256xbf16>
    %c0_6 = arith.constant 0 : index
    %c0_7 = arith.constant 0 : index
    %10 = vector.load %arg4[%c0_6, %c0_7] : memref<256x64xbf16, #tpu.memory_space<vmem>>, vector<256x64xbf16>
    %cst_8 = arith.constant dense<0.000000e+00> : vector<16x64xf32>
    %11 = tpu.matmul %9, %10, %cst_8 {dimension_numbers = #tpu.dot_dimension_numbers<[1], [0], [0], [1], [0, 0, 1, 1], [], []>} : vector<16x256xbf16>, vector<256x64xbf16>, vector<16x64xf32> -> vector<16x64xf32>
    %c0_9 = arith.constant 0 : index
    %c0_10 = arith.constant 0 : index
    %12 = vector.load %arg5[%c0_9, %c0_10] : memref<1x64xf32, #tpu.memory_space<vmem>>, vector<1x64xf32>
    %13 = vector.broadcast %12 : vector<1x64xf32> to vector<16x64xf32>
    %14 = arith.addf %11, %13 : vector<16x64xf32>
    %15 = arith.truncf %14 : vector<16x64xf32> to vector<16x64xbf16>
    %c0_11 = arith.constant 0 : index
    %c0_12 = arith.constant 0 : index
    %16 = vector.load %arg6[%c0_11, %c0_12] : memref<16x64xbf16, #tpu.memory_space<vmem>>, vector<16x64xbf16>
    tpu.vector_store %arg6[%c0_11, %c0_12], %15 {strides = array<i32>} : memref<16x64xbf16, #tpu.memory_space<vmem>>, vector<16x64xbf16>,
    return
  }
  func.func @transform_0(%arg0: i32) -> (i32, i32) {
    %c0_i32 = arith.constant 0 : i32
    %c0_i32_0 = arith.constant 0 : i32
    return %arg0, %c0_i32 : i32, i32
  }
  func.func @transform_1(%arg0: i32) -> (i32, i32) {
    %c0_i32 = arith.constant 0 : i32
    %c0_i32_0 = arith.constant 0 : i32
    %c0_i32_1 = arith.constant 0 : i32
    return %c0_i32, %c0_i32_0 : i32, i32
  }
  func.func @transform_2(%arg0: i32) -> (i32, i32) {
    %c0_i32 = arith.constant 0 : i32
    %c0_i32_0 = arith.constant 0 : i32
    %c0_i32_1 = arith.constant 0 : i32
    return %c0_i32, %c0_i32_0 : i32, i32
  }
  func.func @transform_3(%arg0: i32) -> (i32, i32) {
    %c0_i32 = arith.constant 0 : i32
    %c0_i32_0 = arith.constant 0 : i32
    %c0_i32_1 = arith.constant 0 : i32
    return %c0_i32, %c0_i32_0 : i32, i32
  }
  func.func @transform_4(%arg0: i32) -> (i32, i32) {
    %c0_i32 = arith.constant 0 : i32
    %c0_i32_0 = arith.constant 0 : i32
    %c0_i32_1 = arith.constant 0 : i32
    return %c0_i32, %c0_i32_0 : i32, i32
  }
  func.func @transform_5(%arg0: i32) -> (i32, i32) {
    %c0_i32 = arith.constant 0 : i32
    %c0_i32_0 = arith.constant 0 : i32
    return %arg0, %c0_i32 : i32, i32
  }
}

</mosaic_0001>

<bundles_post_ra>
// kernel: tpu_custom_call.1
= control target key start
LH: loop header
LB: loop body
LE: loop exit
PB: predicated region body
PF: predicated region fallthrough
CT: control target
= control target key end

     0   :  { %v447_v2 = vmov 0   ;;  %vm85_vm0 = vcmask 523264   ;;  %s568_s0 = inlined_call_operand.vmem [shape: f32[16,64], index: 0, kind: input, shape index: {}]   ;;  %s569_s1 = inlined_call_operand.vmem [shape: bf16[64,256], index: 1, kind: input, shape index: {}]   ;;  %s570_s2 = inlined_call_operand.vmem [shape: f32[1,256], index: 2, kind: input, shape index: {}]   ;;  %s571_s3 = inlined_call_operand.vmem [shape: bf16[256,64], index: 3, kind: input, shape index: {}]   ;;  %s572_s4 = inlined_call_operand.vmem [shape: f32[1,64], index: 4, kind: input, shape index: {}]   ;;  %s573_s5 = inlined_call_operand.hbm [shape: bf16[16,64], index: 5, kind: output, shape index: {}]  }
   0x1   :  { %v397_v0 = vld [vmem:[%s569_s1 + $0x34] ss:$8 sps:$4 sm:$0xff]   ;;  %v399_v1 = vld [vmem:[%s569_s1 + $0x30] ss:$8 sps:$4 sm:$0xff]   ;;  %121 = vmatprep.mubr.bf16.mxu0 %v447_v2  ;;  %v400_v3 = vld [vmem:[%s569_s1 + $0x24] ss:$8 sps:$4 sm:$0xff]  }
   0x2   :  { %97 = vmatprep.subr.bf16.mxu0 %v397_v0  ;;  %v402_v4 = vld [vmem:[%s569_s1 + $0x20] ss:$8 sps:$4 sm:$0xff]   ;;  %v403_v5 = vld [vmem:[%s569_s1 + $0x14] ss:$8 sps:$4 sm:$0xff]   ;;  %v405_v6 = vld [vmem:[%s569_s1 + $0x10] ss:$8 sps:$4 sm:$0xff]  }
   0x3   :  { %98 = vmatpush1.bf16.msra.mxu0 %v399_v1  ;;  %v406_v7 = vld [vmem:[%s569_s1 + $0x4] ss:$8 sps:$4 sm:$0xff]   ;;  %v409_v8 = vld [vmem:[%s571_s3 + $0x78] sm:$0xff]   ;;  %v411_v10 = vld [vmem:[%s571_s3 + $0x70] sm:$0xff]  }
   0x4   :  { %99 = vmatprep.subr.bf16.mxu0 %v400_v3  ;;  %v410_v9 = vld [vmem:[%s571_s3 + $0x38] sm:$0xff]   ;;  %371 = vmatprep.subr.bf16.mxu1 %v409_v8  ;;  %v408_v11 = vld [vmem:[%s569_s1] ss:$8 sps:$4 sm:$0xff]   ;;  %v412_v13 = vld [vmem:[%s571_s3 + $0x30] sm:$0xff]  }
   0x5   :  { %v22_v12 = vld [vmem:[%s568_s0] sm:$0xff]  ;;  %372 = vmatpush3.bf16.msra.mxu1 %v410_v9  ;;  %v413_v14 = vld [vmem:[%s571_s3 + $0x68] sm:$0xff]   ;;  %v417_v20 = vld [vmem:[%s571_s3 + $0x58] sm:$0xff]  }
   0x6   :  { %373 = vmatprep.subr.bf16.mxu1 %v411_v10  ;;  %v23_v15 = vld [vmem:[%s568_s0 + $0x8] sm:$0xff]  ;;  %v415_v18 = vld [vmem:[%s571_s3 + $0x60] sm:$0xff]  }
   0x7   :  { %100 = vmatpush1.bf16.msra.mxu0 %v402_v4  ;;  %v414_v16 = vld [vmem:[%s571_s3 + $0x28] sm:$0xff]   ;;  %v24_v17 = vpack.c.bf16 %v23_v15, %v22_v12  ;;  %v416_v19 = vld [vmem:[%s571_s3 + $0x20] sm:$0xff]  }
   0x8   :  { %101 = vmatprep.subr.bf16.mxu0 %v403_v5 }
   0x9   :  { %374 = vmatpush3.bf16.msra.mxu1 %v412_v13 }
   0xa   :  { %375 = vmatprep.subr.bf16.mxu1 %v413_v14 }
   0xb   :  { %102 = vmatpush1.bf16.msra.mxu0 %v405_v6 }
   0xc   :  { %103 = vmatprep.subr.bf16.mxu0 %v406_v7 }
   0xd   :  { %376 = vmatpush3.bf16.msra.mxu1 %v414_v16 }
   0xe   :  { %377 = vmatprep.subr.bf16.mxu1 %v415_v18 }
   0xf   :  { %104 = vmatpush1.bf16.msra.mxu0 %v408_v11 }
  0x12   :  { %349 = vmatmul.mubr.msk.bf16.vlgmr.msra.gmra.mxu0 %vm85_vm0, %v24_v17 }
  0x13   :  { %10 = vsyncpa [#allocation3], 0  ;;  %378 = vmatpush3.bf16.msra.mxu1 %v416_v19  ;;  %v418_v21 = vld [vmem:[%s571_s3 + $0x18] sm:$0xff]   ;;  %v419_v22 = vld [vmem:[%s571_s3 + $0x50] sm:$0xff]   ;;  %v35_v28 = vlaneseq  ;;  %vm322_vm1 = vcmask 519168   ;;  %s448_s20 = smov [#allocation2]  }
  0x14   :  { %379 = vmatprep.subr.bf16.mxu1 %v417_v20  ;;  %v420_v23 = vld [vmem:[%s571_s3 + $0x10] sm:$0xff]   ;;  %v421_v24 = vld [vmem:[%s571_s3 + $0x48] sm:$0xff]   ;;  %v423_v26 = vld [vmem:[%s571_s3 + $0x40] sm:$0xff]   ;;  %s330_s21 = sshll.u32 %s448_s20, 4  ;;  %s331_s21 = int_to_ptr.vmem [resolvable:$true] %s330_s21 }
  0x15   :  { %v422_v25 = vld [vmem:[%s571_s3 + $0x8] sm:$0xff]   ;;  %v424_v27 = vld [vmem:[%s571_s3] sm:$0xff]   ;;  %v36_v29 = vshrl.u32 %v35_v28, 7  ;;  %s425_s22 = scalar_lea.vmem %s331_s21, 128  ;;  %p430_p1 = scmp.lt.s32.totalorder %s331_s21, %s331_s21 }
  0x16   :  { %v33_v32 = vld [vmem:[%s570_s2] sm:$0x3]  ;;  %p426_p0 = scmp.ne.s32.totalorder %s331_s21, %s425_s22  ;;  %p431_p2 = scmp.lt.s32.totalorder %s425_s22, %s425_s22 }
  0x17   :  { %380 = vmatpush3.bf16.msra.mxu1 %v418_v21  ;;  %v41_v30 = vsub.s32 1, %v36_v29  ;;  %v37_v31 = vsub.s32 0, %v36_v29  ;;  %v350_v50 = vld [vmem:[%s572_s4] ss:$0 sm:$0xff] }
  0x18   :  { %381 = vmatprep.subr.bf16.mxu1 %v419_v22  ;;  %p432_p3 = por %p431_p2, %p430_p1 }
  0x19   :  { %v42_v34 = vrot.slane %v33_v32, %v41_v30  ;;  %v38_v35 = vrot.slane %v33_v32, %v37_v31 }
  0x1a   :  { %p433_p4 = pnand %p432_p3, %p426_p0 }
  0x1b   :  { %382 = vmatpush3.bf16.msra.mxu1 %v420_v23 }
  0x1c   :  { %383 = vmatprep.subr.bf16.mxu1 %v421_v24 }
  0x1f   :  { %384 = vmatpush3.bf16.msra.mxu1 %v422_v25 }
  0x20   :  { %385 = vmatprep.subr.bf16.mxu1 %v423_v26 }
  0x23   :  { %386 = vmatpush3.bf16.msra.mxu1 %v424_v27 }
  0xd2   :  { %v123_v33 = vpop.f32.mrf.mxu0 }
  0xd3   :  { %v124_v40 = vadd.f32 %v123_v33, %v38_v35 }
  0xd4   :  { %v125_v36 = vpop.f32.mrf.mxu0 }
  0xd5   :  { %v126_v38 = vadd.f32 %v125_v36, %v42_v34  ;;  %v132_v46 = vmax.f32 %v124_v40, 0.0 }
  0xd6   :  { %v127_v37 = vpop.f32.mrf.mxu0 }
  0xd7   :  { %v128_v39 = vadd.f32 %v127_v37, %v38_v35  ;;  %v133_v44 = vmax.f32 %v126_v38, 0.0 }
  0xd8   :  { %v129_v41 = vpop.f32.mrf.mxu0 }
  0xd9   :  { %v130_v42 = vadd.f32 %v129_v41, %v42_v34  ;;  %v134_v43 = vmax.f32 %v128_v39, 0.0 }
  0xdb   :  { %v135_v45 = vmax.f32 %v130_v42, 0.0  ;;  %v136_v48 = vpack.c.bf16 %v134_v43, %v132_v46 }
  0xdd   :  { %v137_v47 = vpack.c.bf16 %v135_v45, %v133_v44 }
  0xdf   :  { %305 = vmatprep.mubr.bf16.mxu1 %v137_v47 }
  0xe0   :  { %306 = vmatmul.mubr.bf16.vlgmr.msra.gmra.mxu1 %v136_v48 }
 0x1a0   :  { %v387_v49 = vpop.f32.mrf.mxu1 }
 0x1a2   :  { %v388_v51 = vpop.f32.mrf.mxu1 }
 0x1a3   :  { %v389_v52 = vadd.f32 %v388_v51, %v387_v49 }
 0x1a4   :  { %v390_v53 = vpop.f32.mrf.mxu1 }
 0x1a5   :  { %v308_v54 = vadd.f32 %v389_v52, %v350_v50 }
 0x1a6   :  { %v391_v55 = vpop.f32.mrf.mxu1 }
 0x1a7   :  { %v369_v56 = vpack.c.bf16 %v308_v54, %v308_v54  ;;  %v392_v57 = vadd.f32 %v391_v55, %v390_v53 }
 0x1a9   :  { %323 = vst.msk [vmem:[#allocation2] sm:$0xf] %vm322_vm1, %v369_v56  ;;  %v311_v58 = vadd.f32 %v392_v57, %v350_v50 }
 0x1ab   :  { %v370_v59 = vpack.c.bf16 %v311_v58, %v311_v58 }
 0x1ad   :  { %324 = vst.msk [vmem:[#allocation2 + $0x4] sm:$0xf] %vm322_vm1, %v370_v59 }
 0x1ae   :  { %436 = shalt.err (!%p433_p4)
}
 0x1af   :  { %s449_s4 = smov 64   ;;  %s450_s1 = smov 4  }
 0x1b0   :  { %336 = dma.vmem_to_hbm [thread:$0]  %s331_s21, 128, %s573_s5, [#allocation3], %s449_s4, %s449_s4, %s450_s1  }
 0x1b1   :  { %445 = dma.done.wait [#allocation3], 128  }
 0x1b2   :  { %446 = vsyncadd [#allocation3], 4294967168 }
 0x1b3   :  { %340 = vsyncpa [#allocation3], 1 }

</bundles_post_ra>
